<compile_context>
chip_gen: v5e
topology: v5e:2x2
jax: 0.10.0
libtpu: 0.0.40
codegen_flags: <defaults>
</compile_context>

<pallas_src>
import functools

import jax
import jax.numpy as jnp
from jax.experimental import pallas as pl
from jax.experimental.pallas import tpu as pltpu


def _prelu(v, a):
    return jnp.where(v >= 0.0, v, a * v)


def bottleneck_kernel(x_ref, wd_ref, bd_ref, wm_ref, bm_ref, wu_ref, bu_ref,
                      mask_ref, alpha_ref, o_ref, taps_ref, *, W, K, tap_dtype):
    """One batch tile: x_ref (Cin, TILE) -> o_ref (Cout, TILE), TILE = B_TILE*H*W."""
    a_down = alpha_ref[0]
    a_main = alpha_ref[1]
    a_up = alpha_ref[2]
    a_out = alpha_ref[3]

    pad = K // 2
    cp = wd_ref.shape[0]              # padded internal channel count
    TILE = x_ref.shape[1]

    # ---- conv_down: 1x1 conv (BN scale pre-folded into weights) + shift + PReLU
    t = jnp.dot(wd_ref[...], x_ref[...].astype(jnp.bfloat16),
                preferred_element_type=jnp.float32)                    # (cp, TILE)
    t = _prelu(t + bd_ref[...], a_down).astype(tap_dtype)

    # ---- conv_main: K*K taps via lane rolls + precomputed boundary masks,
    #      written straight into the taps scratch, then ONE MXU push. -----------
    for dy in range(K):
        for dx in range(K):
            i = dy * K + dx
            off = (dy - pad) * W + (dx - pad)          # flat shift of the input tap
            if off == 0:
                patch = t                               # center tap: no roll, no mask
            else:
                shifted = pltpu.roll(t, shift=(-off) % TILE, axis=1)
                patch = shifted * mask_ref[pl.ds(i, 1), :]
            taps_ref[pl.ds(i * cp, cp), :] = patch

    acc = jnp.dot(wm_ref[...], taps_ref[...].astype(jnp.bfloat16),
                  preferred_element_type=jnp.float32)                  # (cp, TILE)
    acc = _prelu(acc + bm_ref[...], a_main)

    # ---- conv_up: 1x1 conv + shift + PReLU ------------------------------------
    u = jnp.dot(wu_ref[...], acc.astype(jnp.bfloat16),
                preferred_element_type=jnp.float32)                    # (Cout, TILE)
    u = _prelu(u + bu_ref[...], a_up)

    # ---- Dropout2d(p=0) is identity; residual add + output PReLU --------------
    # TODO(synk): Dropout2d is identity here (p=0 / eval); no stochastic masking.
    # Re-read x_ref instead of keeping a (Cin, TILE) value live across the 3x3.
    o_ref[...] = _prelu(x_ref[...] + u, a_out).astype(o_ref.dtype)


def fold_bn(gamma, beta, mean, var, eps=1e-5):
    scale = gamma * jax.lax.rsqrt(var + eps)
    shift = beta - mean * scale
    return scale, shift


def _pad_rows(a, n):
    return jnp.pad(a, ((0, n - a.shape[0]),) + ((0, 0),) * (a.ndim - 1))


def prepare_params(params, *, K, tap_dtype):
    """Fold BN scales into the (transposed) conv weights, pad internal channels
    to a sublane-tile multiple, cast MXU operands to bf16 (shifts stay f32).

    Invariant: padded internal channels use ZERO weights and ZERO BN shifts so
    PReLU(0) == 0 keeps them exactly zero through conv_main / conv_up."""
    wd, (sd, bd), wm, (sm, bm), wu, (su, bu), alphas = params
    Cin, Cint = wd.shape
    Cout = wu.shape[1]
    # bf16 taps need 16-row sublane tiles so every patch row-block stays aligned.
    align = 16 if tap_dtype == jnp.bfloat16 else 8
    Cp = max(align, -(-Cint // align) * align)

    wd_f = _pad_rows(wd.T * sd[:, None], Cp).astype(jnp.bfloat16)        # (Cp, Cin)
    bd_f = _pad_rows(bd.reshape(-1, 1).astype(jnp.float32), Cp)          # (Cp, 1)

    wm_t = (jnp.transpose(wm, (3, 0, 1, 2)).reshape(Cint, K * K, Cint)
            * sm[:, None, None])
    wm_p = jnp.zeros((Cp, K * K, Cp), jnp.float32).at[:Cint, :, :Cint].set(wm_t)
    wm_f = wm_p.reshape(Cp, K * K * Cp).astype(jnp.bfloat16)             # (Cp, K*K*Cp)
    bm_f = _pad_rows(bm.reshape(-1, 1).astype(jnp.float32), Cp)          # (Cp, 1)

    wu_f = jnp.pad(wu.T * su[:, None],
                   ((0, 0), (0, Cp - Cint))).astype(jnp.bfloat16)        # (Cout, Cp)
    bu_f = bu.reshape(-1, 1).astype(jnp.float32)                         # (Cout, 1)

    return wd_f, bd_f, wm_f, bm_f, wu_f, bu_f, alphas.astype(jnp.float32)


def _make_masks(H, W, b_tile, K, dtype):
    """(K*K, b_tile*H*W) 0/1 boundary masks for the rolled taps (wrapper-side)."""
    HW = H * W
    p = jnp.arange(b_tile * HW)
    r = (p % HW) // W
    c = p % W
    pad = K // 2
    rows = []
    for dy in range(K):
        for dx in range(K):
            rr = r + (dy - pad)
            cc = c + (dx - pad)
            rows.append((rr >= 0) & (rr < H) & (cc >= 0) & (cc < W))
    return jnp.stack(rows, axis=0).astype(dtype)


def _tap_dtype():
    """bf16 roll/mask/taps on v6e/v7x (bf16 VPU); f32 elsewhere (v5e and older)."""
    try:
        kind = jax.devices()[0].device_kind.lower()
    except Exception:
        return jnp.float32
    if any(tag in kind for tag in ("v6", "v7", "7x")):
        return jnp.bfloat16
    return jnp.float32


def _choose_batch_tile(N, HW, target_lanes=2048):
    """Largest divisor of N with bt*HW <= target_lanes, keeping >= 2 grid steps
    when N > 1 so the pipeline can overlap DMA and both v7x TCs get work."""
    max_bt = max(1, target_lanes // HW)
    if N > 1:
        max_bt = min(max_bt, max(1, N // 2))
    bt = max(1, min(N, max_bt))
    while N % bt:
        bt -= 1
    return bt


def regular_bottleneck(x_nchw, params, *, K=3, batch_tile=None):
    """Fused ENet RegularBottleNeck (eval mode).  Assumes the module defaults:
    stride=1, dilation=1, padding=K//2, bias=False, dropout_prob=0."""
    N, Cin, H, W = x_nchw.shape
    assert K % 2 == 1, "roll/mask 3x3 path assumes odd kernel, padding=K//2"
    HW = H * W

    tap_dtype = _tap_dtype()
    wd_f, bd_f, wm_f, bm_f, wu_f, bu_f, alphas = prepare_params(
        params, K=K, tap_dtype=tap_dtype)
    Cp = wd_f.shape[0]
    Cout = wu_f.shape[0]
    assert Cin == Cout, "residual add requires in_channels == out_channels"

    B_TILE = batch_tile if batch_tile is not None else _choose_batch_tile(N, HW)
    assert N % B_TILE == 0
    TILE = B_TILE * HW
    n_tiles = N // B_TILE
    assert n_tiles == 1 or TILE % 128 == 0, "lane tile must be a multiple of 128"

    # One cheap (N, C)-axes transpose in the wrapper -> lane-dense (Cin, N*HW).
    x_cnhw = jnp.transpose(x_nchw.reshape(N, Cin, HW), (1, 0, 2)).reshape(Cin, N * HW)

    masks = _make_masks(H, W, B_TILE, K, tap_dtype)                   # (K*K, TILE)

    kernel = functools.partial(bottleneck_kernel, W=W, K=K, tap_dtype=tap_dtype)
    const = lambda shape: pl.BlockSpec(shape, lambda b: (0,) * len(shape))

    # Raise the scoped VMEM limit only when the estimated per-step footprint
    # needs it (matters at production sizes, esp. v7x's 64 MiB VMEM).
    isz = jnp.dtype(tap_dtype).itemsize
    est = (2 * 2 * Cin * TILE * 4                      # x/out double buffers (f32)
           + K * K * Cp * TILE * isz                   # taps scratch
           + (K * K + 4) * Cp * TILE * isz             # masks + live intermediates
           + 2 * Cp * (Cin + K * K * Cp + Cout))       # weights (bf16-ish)
    vmem_limit = int(min(est * 2, 60 << 20)) if est > (24 << 20) else None

    out = pl.pallas_call(
        kernel,
        out_shape=jax.ShapeDtypeStruct((Cout, N * HW), x_nchw.dtype),
        grid_spec=pltpu.PrefetchScalarGridSpec(
            num_scalar_prefetch=0,
            grid=(n_tiles,),
            in_specs=[
                pl.BlockSpec((Cin, TILE), lambda b: (0, b)),          # x
                const((Cp, Cin)),                                     # conv_down W
                const((Cp, 1)),                                       # BN-down shift
                const((Cp, K * K * Cp)),                              # conv_main W
                const((Cp, 1)),                                       # BN-main shift
                const((Cout, Cp)),                                    # conv_up W
                const((Cout, 1)),                                     # BN-up shift
                const((K * K, TILE)),                                 # boundary masks
                pl.BlockSpec(memory_space=pltpu.MemorySpace.SMEM),    # PReLU alphas
            ],
            out_specs=pl.BlockSpec((Cout, TILE), lambda b: (0, b)),
            scratch_shapes=[pltpu.VMEM((K * K * Cp, TILE), tap_dtype)],
        ),
        compiler_params=pltpu.CompilerParams(
            dimension_semantics=("parallel",),
            vmem_limit_bytes=vmem_limit),
    )(x_cnhw, wd_f, bd_f, wm_f, bm_f, wu_f, bu_f, masks, alphas)

    return jnp.transpose(out.reshape(Cout, N, HW), (1, 0, 2)).reshape(N, Cout, H, W)


def reference_forward(x_nchw, params, *, K=3):
    """Pure-JAX NCHW reference using the same folded-BN / bf16-operand policy."""
    wd, (sd, bd), wm, (sm, bm), wu, (su, bu), alphas = params
    a_down, a_main, a_up, a_out = (alphas[i] for i in range(4))
    Cin, Cint = wd.shape
    Cout = wu.shape[1]
    dn = ('NCHW', 'HWIO', 'NCHW')
    pd = K // 2

    wd_c = (wd * sd[None, :]).astype(jnp.bfloat16).reshape(1, 1, Cin, Cint)
    wm_c = (wm * sm).astype(jnp.bfloat16)
    wu_c = (wu * su[None, :]).astype(jnp.bfloat16).reshape(1, 1, Cint, Cout)

    def conv(v, w, padding):
        return jax.lax.conv_general_dilated(
            v.astype(jnp.bfloat16), w, (1, 1), padding,
            dimension_numbers=dn, preferred_element_type=jnp.float32)

    t = _prelu(conv(x_nchw, wd_c, 'VALID') + bd.reshape(1, Cint, 1, 1), a_down)
    m = _prelu(conv(t, wm_c, [(pd, pd), (pd, pd)]) + bm.reshape(1, Cint, 1, 1),
               a_main)
    u = _prelu(conv(m, wu_c, 'VALID') + bu.reshape(1, Cout, 1, 1), a_up)
    return _prelu(x_nchw + u, a_out)


if __name__ == "__main__":
    key = jax.random.PRNGKey(0)
    N, Cin, H, W = 2, 16, 16, 16           # PyTorch-style NCHW input shape
    Cout = Cin
    Cint = Cin // 4
    K = 3

    ks = jax.random.split(key, 8)
    x_nchw = jax.random.normal(ks[0], (N, Cin, H, W), jnp.float32)

    # Conv weights (no bias, matching the module's bias=False default)
    wd = jax.random.normal(ks[1], (Cin, Cint), jnp.float32) * 0.2
    wm = jax.random.normal(ks[2], (K, K, Cint, Cint), jnp.float32) * 0.2   # HWIO
    wu = jax.random.normal(ks[3], (Cint, Cout), jnp.float32) * 0.2

    # BatchNorm parameters (eval-mode running stats, folded to scale/shift)
    def bn_params(k, C):
        kg, kb, km, kv = jax.random.split(k, 4)
        gamma = 1.0 + 0.1 * jax.random.normal(kg, (C,), jnp.float32)
        beta = 0.1 * jax.random.normal(kb, (C,), jnp.float32)
        mean = 0.1 * jax.random.normal(km, (C,), jnp.float32)
        var = 1.0 + 0.1 * jnp.abs(jax.random.normal(kv, (C,), jnp.float32))
        return fold_bn(gamma, beta, mean, var)

    bn_down = bn_params(ks[4], Cint)
    bn_main = bn_params(ks[5], Cint)
    bn_up = bn_params(ks[6], Cout)

    # PReLU alphas (PyTorch default: single parameter, init 0.25)
    alphas = jnp.full((4,), 0.25, jnp.float32)   # down, main, up, out

    params = (wd, bn_down, wm, bn_main, wu, bn_up, alphas)

    out = regular_bottleneck(x_nchw, params, K=K)
    out = jax.block_until_ready(out)

    ref = reference_forward(x_nchw, params, K=K)
    assert out.shape == (N, Cout, H, W)
    # bf16 MXU operands: tolerance covers occasional 1-ulp bf16 rounding-boundary
    # differences between kernel and XLA-conv reference (real bugs are >> 1e-2).
    assert jnp.allclose(out, ref, atol=1e-2, rtol=1e-2), "mismatch vs reference"

    print("KERNEL_OK")
</pallas_src>

<mosaic_0001>
module attributes {stable_mosaic.version = 11 : i64} {
  func.func @bottleneck_kernel(%arg0: i32, %arg1: memref<16x256xf32, #tpu.memory_space<vmem>>, %arg2: memref<8x16xbf16, #tpu.memory_space<vmem>>, %arg3: memref<8x1xf32, #tpu.memory_space<vmem>>, %arg4: memref<8x72xbf16, #tpu.memory_space<vmem>>, %arg5: memref<8x1xf32, #tpu.memory_space<vmem>>, %arg6: memref<16x8xbf16, #tpu.memory_space<vmem>>, %arg7: memref<16x1xf32, #tpu.memory_space<vmem>>, %arg8: memref<9x256xf32, #tpu.memory_space<vmem>>, %arg9: memref<4xf32, #tpu.memory_space<smem>>, %arg10: memref<16x256xf32, #tpu.memory_space<vmem>>, %arg11: memref<72x256xf32, #tpu.memory_space<vmem>>) attributes {dimension_semantics = [#tpu.dimension_semantics<parallel>], iteration_bounds = array<i64: 2>, scalar_prefetch = 0 : i64, scratch_operands = 1 : i64, tpu.core_type = #tpu.core_type<tc>, window_params = [{transform_indices = @transform_0, window_bounds = array<i64: 16, 256>}, {pipeline_mode = #tpu.pipeline_mode<synchronous>, transform_indices = @transform_1, window_bounds = array<i64: 8, 16>}, {pipeline_mode = #tpu.pipeline_mode<synchronous>, transform_indices = @transform_2, window_bounds = array<i64: 8, 1>}, {pipeline_mode = #tpu.pipeline_mode<synchronous>, transform_indices = @transform_3, window_bounds = array<i64: 8, 72>}, {pipeline_mode = #tpu.pipeline_mode<synchronous>, transform_indices = @transform_4, window_bounds = array<i64: 8, 1>}, {pipeline_mode = #tpu.pipeline_mode<synchronous>, transform_indices = @transform_5, window_bounds = array<i64: 16, 8>}, {pipeline_mode = #tpu.pipeline_mode<synchronous>, transform_indices = @transform_6, window_bounds = array<i64: 16, 1>}, {pipeline_mode = #tpu.pipeline_mode<synchronous>, transform_indices = @transform_7, window_bounds = array<i64: 9, 256>}, {transform_indices = @transform_8, window_bounds = array<i64: 4>}, {transform_indices = @transform_9, window_bounds = array<i64: 16, 256>}]} {
    %c0 = arith.constant 0 : index
    %0 = memref.load %arg9[%c0] : memref<4xf32, #tpu.memory_space<smem>>
    %c1 = arith.constant 1 : index
    %1 = memref.load %arg9[%c1] : memref<4xf32, #tpu.memory_space<smem>>
    %c2 = arith.constant 2 : index
    %2 = memref.load %arg9[%c2] : memref<4xf32, #tpu.memory_space<smem>>
    %c3 = arith.constant 3 : index
    %3 = memref.load %arg9[%c3] : memref<4xf32, #tpu.memory_space<smem>>
    %c0_0 = arith.constant 0 : index
    %c0_1 = arith.constant 0 : index
    %4 = vector.load %arg2[%c0_0, %c0_1] : memref<8x16xbf16, #tpu.memory_space<vmem>>, vector<8x16xbf16>
    %c0_2 = arith.constant 0 : index
    %c0_3 = arith.constant 0 : index
    %5 = vector.load %arg1[%c0_2, %c0_3] : memref<16x256xf32, #tpu.memory_space<vmem>>, vector<16x256xf32>
    %6 = arith.truncf %5 : vector<16x256xf32> to vector<16x256xbf16>
    %cst = arith.constant dense<0.000000e+00> : vector<8x256xf32>
    %7 = tpu.matmul %4, %6, %cst {dimension_numbers = #tpu.dot_dimension_numbers<[1], [0], [0], [1], [0, 0, 1, 1], [], []>} : vector<8x16xbf16>, vector<16x256xbf16>, vector<8x256xf32> -> vector<8x256xf32>
    %c0_4 = arith.constant 0 : index
    %c0_5 = arith.constant 0 : index
    %8 = vector.load %arg3[%c0_4, %c0_5] : memref<8x1xf32, #tpu.memory_space<vmem>>, vector<8x1xf32>
    %9 = vector.broadcast %8 : vector<8x1xf32> to vector<8x256xf32>
    %10 = arith.addf %7, %9 : vector<8x256xf32>
    %cst_6 = arith.constant 0.000000e+00 : f32
    %11 = vector.broadcast %cst_6 : f32 to vector<8x256xf32>
    %12 = arith.cmpf oge, %10, %11 : vector<8x256xf32>
    %13 = vector.broadcast %0 : f32 to vector<8x256xf32>
    %14 = arith.mulf %13, %10 : vector<8x256xf32>
    %15 = arith.select %12, %10, %14 : vector<8x256xi1>, vector<8x256xf32>
    %c17_i32 = arith.constant 17 : i32
    %16 = tpu.dynamic_rotate %15 by %c17_i32 dim 1 : vector<8x256xf32>, i32 -> vector<8x256xf32>
    %c0_7 = arith.constant 0 : index
    %c0_8 = arith.constant 0 : index
    %17 = vector.load %arg8[%c0_7, %c0_8] : memref<9x256xf32, #tpu.memory_space<vmem>>, vector<1x256xf32>
    %18 = vector.broadcast %17 : vector<1x256xf32> to vector<8x256xf32>
    %19 = arith.mulf %16, %18 : vector<8x256xf32>
    %c0_9 = arith.constant 0 : index
    %c0_10 = arith.constant 0 : index
    %20 = vector.load %arg11[%c0_9, %c0_10] : memref<72x256xf32, #tpu.memory_space<vmem>>, vector<8x256xf32>
    tpu.vector_store %arg11[%c0_9, %c0_10], %19 {strides = array<i32>} : memref<72x256xf32, #tpu.memory_space<vmem>>, vector<8x256xf32>,
    %c16_i32 = arith.constant 16 : i32
    %21 = tpu.dynamic_rotate %15 by %c16_i32 dim 1 : vector<8x256xf32>, i32 -> vector<8x256xf32>
    %c1_11 = arith.constant 1 : index
    %c0_12 = arith.constant 0 : index
    %22 = vector.load %arg8[%c1_11, %c0_12] : memref<9x256xf32, #tpu.memory_space<vmem>>, vector<1x256xf32>
    %23 = vector.broadcast %22 : vector<1x256xf32> to vector<8x256xf32>
    %24 = arith.mulf %21, %23 : vector<8x256xf32>
    %c8 = arith.constant 8 : index
    %c0_13 = arith.constant 0 : index
    %25 = vector.load %arg11[%c8, %c0_13] : memref<72x256xf32, #tpu.memory_space<vmem>>, vector<8x256xf32>
    tpu.vector_store %arg11[%c8, %c0_13], %24 {strides = array<i32>} : memref<72x256xf32, #tpu.memory_space<vmem>>, vector<8x256xf32>,
    %c15_i32 = arith.constant 15 : i32
    %26 = tpu.dynamic_rotate %15 by %c15_i32 dim 1 : vector<8x256xf32>, i32 -> vector<8x256xf32>
    %c2_14 = arith.constant 2 : index
    %c0_15 = arith.constant 0 : index
    %27 = vector.load %arg8[%c2_14, %c0_15] : memref<9x256xf32, #tpu.memory_space<vmem>>, vector<1x256xf32>
    %28 = vector.broadcast %27 : vector<1x256xf32> to vector<8x256xf32>
    %29 = arith.mulf %26, %28 : vector<8x256xf32>
    %c16 = arith.constant 16 : index
    %c0_16 = arith.constant 0 : index
    %30 = vector.load %arg11[%c16, %c0_16] : memref<72x256xf32, #tpu.memory_space<vmem>>, vector<8x256xf32>
    tpu.vector_store %arg11[%c16, %c0_16], %29 {strides = array<i32>} : memref<72x256xf32, #tpu.memory_space<vmem>>, vector<8x256xf32>,
    %c1_i32 = arith.constant 1 : i32
    %31 = tpu.dynamic_rotate %15 by %c1_i32 dim 1 : vector<8x256xf32>, i32 -> vector<8x256xf32>
    %c3_17 = arith.constant 3 : index
    %c0_18 = arith.constant 0 : index
    %32 = vector.load %arg8[%c3_17, %c0_18] : memref<9x256xf32, #tpu.memory_space<vmem>>, vector<1x256xf32>
    %33 = vector.broadcast %32 : vector<1x256xf32> to vector<8x256xf32>
    %34 = arith.mulf %31, %33 : vector<8x256xf32>
    %c24 = arith.constant 24 : index
    %c0_19 = arith.constant 0 : index
    %35 = vector.load %arg11[%c24, %c0_19] : memref<72x256xf32, #tpu.memory_space<vmem>>, vector<8x256xf32>
    tpu.vector_store %arg11[%c24, %c0_19], %34 {strides = array<i32>} : memref<72x256xf32, #tpu.memory_space<vmem>>, vector<8x256xf32>,
    %c32 = arith.constant 32 : index
    %c0_20 = arith.constant 0 : index
    %36 = vector.load %arg11[%c32, %c0_20] : memref<72x256xf32, #tpu.memory_space<vmem>>, vector<8x256xf32>
    tpu.vector_store %arg11[%c32, %c0_20], %15 {strides = array<i32>} : memref<72x256xf32, #tpu.memory_space<vmem>>, vector<8x256xf32>,
    %c255_i32 = arith.constant 255 : i32
    %37 = tpu.dynamic_rotate %15 by %c255_i32 dim 1 : vector<8x256xf32>, i32 -> vector<8x256xf32>
    %c5 = arith.constant 5 : index
    %c0_21 = arith.constant 0 : index
    %38 = vector.load %arg8[%c5, %c0_21] : memref<9x256xf32, #tpu.memory_space<vmem>>, vector<1x256xf32>
    %39 = vector.broadcast %38 : vector<1x256xf32> to vector<8x256xf32>
    %40 = arith.mulf %37, %39 : vector<8x256xf32>
    %c40 = arith.constant 40 : index
    %c0_22 = arith.constant 0 : index
    %41 = vector.load %arg11[%c40, %c0_22] : memref<72x256xf32, #tpu.memory_space<vmem>>, vector<8x256xf32>
    tpu.vector_store %arg11[%c40, %c0_22], %40 {strides = array<i32>} : memref<72x256xf32, #tpu.memory_space<vmem>>, vector<8x256xf32>,
    %c241_i32 = arith.constant 241 : i32
    %42 = tpu.dynamic_rotate %15 by %c241_i32 dim 1 : vector<8x256xf32>, i32 -> vector<8x256xf32>
    %c6 = arith.constant 6 : index
    %c0_23 = arith.constant 0 : index
    %43 = vector.load %arg8[%c6, %c0_23] : memref<9x256xf32, #tpu.memory_space<vmem>>, vector<1x256xf32>
    %44 = vector.broadcast %43 : vector<1x256xf32> to vector<8x256xf32>
    %45 = arith.mulf %42, %44 : vector<8x256xf32>
    %c48 = arith.constant 48 : index
    %c0_24 = arith.constant 0 : index
    %46 = vector.load %arg11[%c48, %c0_24] : memref<72x256xf32, #tpu.memory_space<vmem>>, vector<8x256xf32>
    tpu.vector_store %arg11[%c48, %c0_24], %45 {strides = array<i32>} : memref<72x256xf32, #tpu.memory_space<vmem>>, vector<8x256xf32>,
    %c240_i32 = arith.constant 240 : i32
    %47 = tpu.dynamic_rotate %15 by %c240_i32 dim 1 : vector<8x256xf32>, i32 -> vector<8x256xf32>
    %c7 = arith.constant 7 : index
    %c0_25 = arith.constant 0 : index
    %48 = vector.load %arg8[%c7, %c0_25] : memref<9x256xf32, #tpu.memory_space<vmem>>, vector<1x256xf32>
    %49 = vector.broadcast %48 : vector<1x256xf32> to vector<8x256xf32>
    %50 = arith.mulf %47, %49 : vector<8x256xf32>
    %c56 = arith.constant 56 : index
    %c0_26 = arith.constant 0 : index
    %51 = vector.load %arg11[%c56, %c0_26] : memref<72x256xf32, #tpu.memory_space<vmem>>, vector<8x256xf32>
    tpu.vector_store %arg11[%c56, %c0_26], %50 {strides = array<i32>} : memref<72x256xf32, #tpu.memory_space<vmem>>, vector<8x256xf32>,
    %c239_i32 = arith.constant 239 : i32
    %52 = tpu.dynamic_rotate %15 by %c239_i32 dim 1 : vector<8x256xf32>, i32 -> vector<8x256xf32>
    %c8_27 = arith.constant 8 : index
    %c0_28 = arith.constant 0 : index
    %53 = vector.load %arg8[%c8_27, %c0_28] : memref<9x256xf32, #tpu.memory_space<vmem>>, vector<1x256xf32>
    %54 = vector.broadcast %53 : vector<1x256xf32> to vector<8x256xf32>
    %55 = arith.mulf %52, %54 : vector<8x256xf32>
    %c64 = arith.constant 64 : index
    %c0_29 = arith.constant 0 : index
    %56 = vector.load %arg11[%c64, %c0_29] : memref<72x256xf32, #tpu.memory_space<vmem>>, vector<8x256xf32>
    tpu.vector_store %arg11[%c64, %c0_29], %55 {strides = array<i32>} : memref<72x256xf32, #tpu.memory_space<vmem>>, vector<8x256xf32>,
    %c0_30 = arith.constant 0 : index
    %c0_31 = arith.constant 0 : index
    %57 = vector.load %arg4[%c0_30, %c0_31] : memref<8x72xbf16, #tpu.memory_space<vmem>>, vector<8x72xbf16>
    %c0_32 = arith.constant 0 : index
    %c0_33 = arith.constant 0 : index
    %58 = vector.load %arg11[%c0_32, %c0_33] : memref<72x256xf32, #tpu.memory_space<vmem>>, vector<72x256xf32>
    %59 = arith.truncf %58 : vector<72x256xf32> to vector<72x256xbf16>
    %cst_34 = arith.constant dense<0.000000e+00> : vector<8x256xf32>
    %60 = tpu.matmul %57, %59, %cst_34 {dimension_numbers = #tpu.dot_dimension_numbers<[1], [0], [0], [1], [0, 0, 1, 1], [], []>} : vector<8x72xbf16>, vector<72x256xbf16>, vector<8x256xf32> -> vector<8x256xf32>
    %c0_35 = arith.constant 0 : index
    %c0_36 = arith.constant 0 : index
    %61 = vector.load %arg5[%c0_35, %c0_36] : memref<8x1xf32, #tpu.memory_space<vmem>>, vector<8x1xf32>
    %62 = vector.broadcast %61 : vector<8x1xf32> to vector<8x256xf32>
    %63 = arith.addf %60, %62 : vector<8x256xf32>
    %cst_37 = arith.constant 0.000000e+00 : f32
    %64 = vector.broadcast %cst_37 : f32 to vector<8x256xf32>
    %65 = arith.cmpf oge, %63, %64 : vector<8x256xf32>
    %66 = vector.broadcast %1 : f32 to vector<8x256xf32>
    %67 = arith.mulf %66, %63 : vector<8x256xf32>
    %68 = arith.select %65, %63, %67 : vector<8x256xi1>, vector<8x256xf32>
    %c0_38 = arith.constant 0 : index
    %c0_39 = arith.constant 0 : index
    %69 = vector.load %arg6[%c0_38, %c0_39] : memref<16x8xbf16, #tpu.memory_space<vmem>>, vector<16x8xbf16>
    %70 = arith.truncf %68 : vector<8x256xf32> to vector<8x256xbf16>
    %cst_40 = arith.constant dense<0.000000e+00> : vector<16x256xf32>
    %71 = tpu.matmul %69, %70, %cst_40 {dimension_numbers = #tpu.dot_dimension_numbers<[1], [0], [0], [1], [0, 0, 1, 1], [], []>} : vector<16x8xbf16>, vector<8x256xbf16>, vector<16x256xf32> -> vector<16x256xf32>
    %c0_41 = arith.constant 0 : index
    %c0_42 = arith.constant 0 : index
    %72 = vector.load %arg7[%c0_41, %c0_42] : memref<16x1xf32, #tpu.memory_space<vmem>>, vector<16x1xf32>
    %73 = vector.broadcast %72 : vector<16x1xf32> to vector<16x256xf32>
    %74 = arith.addf %71, %73 : vector<16x256xf32>
    %cst_43 = arith.constant 0.000000e+00 : f32
    %75 = vector.broadcast %cst_43 : f32 to vector<16x256xf32>
    %76 = arith.cmpf oge, %74, %75 : vector<16x256xf32>
    %77 = vector.broadcast %2 : f32 to vector<16x256xf32>
    %78 = arith.mulf %77, %74 : vector<16x256xf32>
    %79 = arith.select %76, %74, %78 : vector<16x256xi1>, vector<16x256xf32>
    %c0_44 = arith.constant 0 : index
    %c0_45 = arith.constant 0 : index
    %80 = vector.load %arg1[%c0_44, %c0_45] : memref<16x256xf32, #tpu.memory_space<vmem>>, vector<16x256xf32>
    %81 = arith.addf %80, %79 : vector<16x256xf32>
    %cst_46 = arith.constant 0.000000e+00 : f32
    %82 = vector.broadcast %cst_46 : f32 to vector<16x256xf32>
    %83 = arith.cmpf oge, %81, %82 : vector<16x256xf32>
    %84 = vector.broadcast %3 : f32 to vector<16x256xf32>
    %85 = arith.mulf %84, %81 : vector<16x256xf32>
    %86 = arith.select %83, %81, %85 : vector<16x256xi1>, vector<16x256xf32>
    %c0_47 = arith.constant 0 : index
    %c0_48 = arith.constant 0 : index
    %87 = vector.load %arg10[%c0_47, %c0_48] : memref<16x256xf32, #tpu.memory_space<vmem>>, vector<16x256xf32>
    tpu.vector_store %arg10[%c0_47, %c0_48], %86 {strides = array<i32>} : memref<16x256xf32, #tpu.memory_space<vmem>>, vector<16x256xf32>,
    return
  }
  func.func @transform_0(%arg0: i32) -> (i32, i32) {
    %c0_i32 = arith.constant 0 : i32
    %c0_i32_0 = arith.constant 0 : i32
    return %c0_i32, %arg0 : i32, i32
  }
  func.func @transform_1(%arg0: i32) -> (i32, i32) {
    %c0_i32 = arith.constant 0 : i32
    %c0_i32_0 = arith.constant 0 : i32
    %c0_i32_1 = arith.constant 0 : i32
    return %c0_i32, %c0_i32_0 : i32, i32
  }
  func.func @transform_2(%arg0: i32) -> (i32, i32) {
    %c0_i32 = arith.constant 0 : i32
    %c0_i32_0 = arith.constant 0 : i32
    %c0_i32_1 = arith.constant 0 : i32
    return %c0_i32, %c0_i32_0 : i32, i32
  }
  func.func @transform_3(%arg0: i32) -> (i32, i32) {
    %c0_i32 = arith.constant 0 : i32
    %c0_i32_0 = arith.constant 0 : i32
    %c0_i32_1 = arith.constant 0 : i32
    return %c0_i32, %c0_i32_0 : i32, i32
  }
  func.func @transform_4(%arg0: i32) -> (i32, i32) {
    %c0_i32 = arith.constant 0 : i32
    %c0_i32_0 = arith.constant 0 : i32
    %c0_i32_1 = arith.constant 0 : i32
    return %c0_i32, %c0_i32_0 : i32, i32
  }
  func.func @transform_5(%arg0: i32) -> (i32, i32) {
    %c0_i32 = arith.constant 0 : i32
    %c0_i32_0 = arith.constant 0 : i32
    %c0_i32_1 = arith.constant 0 : i32
    return %c0_i32, %c0_i32_0 : i32, i32
  }
  func.func @transform_6(%arg0: i32) -> (i32, i32) {
    %c0_i32 = arith.constant 0 : i32
    %c0_i32_0 = arith.constant 0 : i32
    %c0_i32_1 = arith.constant 0 : i32
    return %c0_i32, %c0_i32_0 : i32, i32
  }
  func.func @transform_7(%arg0: i32) -> (i32, i32) {
    %c0_i32 = arith.constant 0 : i32
    %c0_i32_0 = arith.constant 0 : i32
    %c0_i32_1 = arith.constant 0 : i32
    return %c0_i32, %c0_i32_0 : i32, i32
  }
  func.func @transform_8(%arg0: i32) -> i32 {
    %c0_i32 = arith.constant 0 : i32
    %c0_i32_0 = arith.constant 0 : i32
    return %c0_i32 : i32
  }
  func.func @transform_9(%arg0: i32) -> (i32, i32) {
    %c0_i32 = arith.constant 0 : i32
    %c0_i32_0 = arith.constant 0 : i32
    return %c0_i32, %arg0 : i32, i32
  }
}

</mosaic_0001>

<bundles_post_ra>
// kernel: tpu_custom_call.1
= control target key start
LH: loop header
LB: loop body
LE: loop exit
PB: predicated region body
PF: predicated region fallthrough
CT: control target
= control target key end

     0   :  { %s1443_s0 = inlined_call_operand.hbm [shape: f32[16,512], index: 0, kind: input, shape index: {}]   ;;  %s1444_s1 = inlined_call_operand.vmem [shape: bf16[8,16], index: 1, kind: input, shape index: {}]   ;;  %s1445_s2 = inlined_call_operand.vmem [shape: f32[8,1], index: 2, kind: input, shape index: {}]   ;;  %s1446_s3 = inlined_call_operand.vmem [shape: bf16[8,72], index: 3, kind: input, shape index: {}]   ;;  %s1447_s4 = inlined_call_operand.vmem [shape: f32[8,1], index: 4, kind: input, shape index: {}]   ;;  %s1448_s5 = inlined_call_operand.vmem [shape: bf16[16,8], index: 5, kind: input, shape index: {}]   ;;  %s1449_s6 = inlined_call_operand.vmem [shape: f32[16,1], index: 6, kind: input, shape index: {}]   ;;  %s1450_s7 = inlined_call_operand.hbm [shape: f32[9,256], index: 7, kind: input, shape index: {}]   ;;  %s1451_s8 = inlined_call_operand.vmem [shape: f32[4], index: 8, kind: input, shape index: {}]   ;;  %s1452_s9 = inlined_call_operand.hbm [shape: f32[16,512], index: 9, kind: output, shape index: {}]  }
   0x1   :  { %1456 = sst [smem:[#allocation17_spill]] %s1450_s7 }
   0x2   :  { %1457 = sst [smem:[#allocation18_spill]] %s1451_s8 }
   0x3   :  { %14 = vsyncpa [#allocation4], 0 }
   0x4   :  { %16 = vsyncpa [#allocation4 + $0x1], 0 }
   0x5   :  { %17 = vsyncpa [#allocation8], 0 }
   0x6   :  { %18 = vsyncpa [#allocation6], 0 }
   0x7   :  { %19 = vsyncpa [#allocation5], 0 }
   0x8   :  { %21 = vsyncpa [#allocation5 + $0x1], 0  ;;  %s1210_s30 = smov 0   ;;  %s1212_s10 = smov 0  }
   0x9   :  { %s1214_s11 = smov 0   ;;  %s1216_s12 = smov 0  }
   0xa LB: > { %1458 = sst [smem:[#allocation15_spill]] %s1138_s11  ;;  %s1231_s13 = sadd.s32 4294967295, %s1142_s12   ;;  %s1142_s12 = sphi %s1216_s12, %s1474_s12   ;;  %s1138_s11 = sphi %s1214_s11, %s1471_s11   ;;  %s1134_s10 = sphi %s1212_s10, %s1473_s10   ;;  %s1130_s30 = sphi %s1210_s30, %s1472_s30  }
   0xb   : > { %s875_s14 = sadd.s32 4294967294, %s1142_s12   ;;  %p47_p0 = scmp.ne.s32.totalorder %s1134_s10, %s1130_s30 }
   0xc   : > { %p48_p1 = scmp.eq.s32.totalorder %s1231_s13, 0  ;;  %p239_p2 = scmp.eq.s32.totalorder %s1231_s13, 1 }
   0xd   : > { %p245_p3 = scmp.eq.s32.totalorder %s875_s14, 1  ;;  %p876_p5 = scmp.ge.s32.totalorder %s1142_s12, 1 }
   0xe   : > { %p1240_p4 = por %p48_p1, %p47_p0  ;;  %p252_p7 = scmp.lt.s32.totalorder %s1142_s12, 3 }
   0xf   : > { %p1245_p6 = por %p245_p3, %p47_p0  ;;  %s1461_s7 = sld [smem:[#allocation17_spill]] }
  0x10   : > { %p1253_p8 = pnand %p876_p5, %p252_p7  ;;  %s1144_s21 = smov [#allocation7]  }
  0x11   : > { %s283_s22 = sshll.u32 %s1144_s21, 4  ;;  %s1463_s8 = sld [smem:[#allocation18_spill]]  ;;  %s284_s22 = int_to_ptr.vmem [resolvable:$true] %s283_s22 }
  0x12   : > { %p921_p9 = pneg %p1253_p8  ;;  %s1453_s26 = smov 256  }
  0x13   : > { %s1454_s27 = smov 16   ;;  %s1147_s28 = smov [#allocation9]  }
  0x14   : > { %p922_p10 = pnand %p921_p9, %p48_p1  ;;  %s1269_s29 = sadd.s32 1, %s1142_s12  }
  0x15   : > { %s281_s19 = sshll.u32 %s1461_s7, 4  ;;  %s31_s14 = ssub.s32 %s1142_s12, %s1269_s29  ;;  %s282_s19 = int_to_ptr.hbm [resolvable:$true] %s281_s19 }
  0x16   : > { %924 = dma.hbm_to_vmem [thread:$0]  (!%p922_p10), %s282_s19, 512, %s284_s22, [#allocation8], %s1453_s26, %s1453_s26, %s1454_s27  }
  0x17   : > { %s296_s25 = sshll.u32 %s1463_s8, 4  ;;  %p32_p12 = scmp.eq.s32.totalorder %s31_s14, 0  ;;  %s297_s25 = int_to_ptr.vmem [resolvable:$true] %s296_s25 }
  0x18   : > { %927 = dma.vmem_to_smem (!%p922_p10), %s297_s25, 16, %s1147_s28, [#allocation6]  }
  0x19   : > { %s34_s17 = sadd.s32 1, %s1138_s11  ;;  %p41_p13 = scmp.ne.s32.totalorder %s1138_s11, %s1134_s10 }
  0x1a   : > { %p42_p0 = scmp.eq.s32.totalorder %s1142_s12, 0  ;;  %p938_p7 = scmp.lt.s32.totalorder %s1142_s12, 2 }
  0x1b   : > { %s1278_s18 = scalar_select %p32_p12, %s1138_s11, %s34_s17  }
  0x1c   : > { %p43_p3 = por %p42_p0, %p41_p13  ;;  %p1282_p5 = por %p239_p2, %p41_p13 }
  0x1d   : > { %1464 = sst [smem:[#allocation16_spill]] %s1278_s18  ;;  %s307_s19 = sand.u32 1, %s1138_s11  }
  0x1e   : > { %s880_s22 = sshll.u32 %s307_s19, 5  ;;  %s906_s23 = sshll.u32 %s1142_s12, 4 }
  0x1f   : > { %s316_s28 = scalar_lea.hbm %s1443_s0, %s906_s23  ;;  %s311_s14 = scalar_lea.vmem [#allocation3], %s880_s22 }
  0x20   : > { %s319_s26 = sshll.u32 %s311_s14, 4  ;;  %s317_s27 = sshll.u32 %s316_s28, 4  ;;  %s320_s26 = int_to_ptr.vmem [resolvable:$true] %s319_s26  ;;  %s318_s27 = int_to_ptr.hbm [resolvable:$true] %s317_s27 }
  0x21   : > { %p1292_p9 = pnand %p938_p7, %p43_p3  ;;  %s308_s7 = scalar_lea.sflag [#allocation4], %s307_s19 }
  0x22   : > { %s1038_s8 = sshra.s32 %s318_s27, 4  ;;  %s1045_s24 = scalar_lea.hbm %s1443_s0, 64  ;;  %s1039_s8 = int_to_ptr.hbm [resolvable:$true] %s1038_s8 }
  0x23   : > { %s1040_s18 = scalar_lea.hbm %s1039_s8, 32  ;;  %p1042_p10 = pneg %p1292_p9 }
  0x24   : > { %p1041_p2 = scmp.ne.s32.totalorder %s1039_s8, %s1040_s18  ;;  %p1046_p0 = scmp.lt.s32.totalorder %s1039_s8, %s1443_s0 }
  0x25   : > { %p1047_p3 = scmp.lt.s32.totalorder %s1045_s24, %s1040_s18 }
  0x26   : > { %p1043_p12 = pnand %p1042_p10, %p1041_p2 }
  0x27   : > { %p1048_p7 = por %p1047_p3, %p1046_p0 }
  0x28   : > { %p1044_p13 = pneg %p1043_p12 }
  0x2a   : > { %p1049_p11 = pnand %p1048_p7, %p1044_p13 }
  0x2c   : > { %1052 = shalt.err (!%p1049_p11)
}
  0x2d   : > { %s1148_s19 = smov 512   ;;  %s1467_s14 = smov 16  }
  0x2e   : > { %s1468_s11 = smov 256   ;;  %331 = sbr.rel (%p1253_p8) target bundleno = 651 (0x28b), region = 56 }
  0x2f   : > { %931 = dma.hbm_to_vmem [thread:$0]  (!%p1292_p9), %s318_s27, 512, %s320_s26, %s308_s7, %s1148_s19, %s1468_s11, %s1467_s14  }
  0x30   : > { %s1311_s23 = sand.u32 (!%p1253_p8), 1, %s1134_s10  }
  0x31   : > { %s884_s8 = sshll.u32 (!%p1253_p8), %s1311_s23, 5  ;;  %s334_s18 = scalar_lea.sflag (!%p1253_p8), [#allocation4], %s1311_s23 }
  0x32   : > { %s337_s22 = scalar_lea.vmem (!%p1253_p8), [#allocation3], %s884_s8 }
  0x33   : > { %1113 = dma.done.wait (%p1240_p4), %s334_s18, 512  }
  0x34   : > { %1115 = vsyncadd (%p1240_p4), %s334_s18, 4294966784 }
  0x35   : > { %1117 = dma.done.wait (%p48_p1), [#allocation8], 512  }
  0x36   : > { %1119 = vsyncadd (%p48_p1), [#allocation8], 4294966784 }
  0x37   : > { %1121 = dma.done.wait (%p48_p1), [#allocation6], 16  }
  0x38   : > { %1123 = vsyncadd (%p48_p1), [#allocation6], 4294967280 }
  0x39   : > { %353 = sfence }
  0x3a   : > { %v1329_v0 = vld [vmem:[%s337_s22] sm:$0xff]  ;;  %v1331_v1 = vld [vmem:[%s337_s22 + $0x10] sm:$0xff]  ;;  %v1333_v2 = vld [vmem:[%s337_s22 + $0x8] sm:$0xff]  ;;  %v1149_v5 = vmov 0   ;;  %vm404_vm0 = vcmask 130048   ;;  %s387_s26 = sld [smem:[#allocation9]]  ;;  %v445_v22 = vlaneseq }
  0x3b   : > { %v396_v3 = vpack.c.bf16 %v1331_v1, %v1329_v0  ;;  %v1337_v4 = vld [vmem:[%s337_s22 + $0x18] sm:$0xff]  ;;  %990 = vset.pattern.permute.xlu0 %v1149_v5  ;;  %v398_v6 = vld [vmem:[%s1445_s2] sm:$0xff]  ;;  %991 = vset.pattern.permute.xlu2 %v1149_v5  ;;  %s1150_s27 = smov 111   ;;  %s1151_s17 = smov 113   ;;  %vm627_vm4 = vcmask 1043456   ;;  %vm623_vm12 = vcmask 588800  }
  0x3c   : > { %v397_v7 = vpack.c.bf16 %v1337_v4, %v1333_v2  ;;  %401 = vperm.xlu0 %990, %v398_v6   ;;  %992 = vset.pattern.permute.xlu1 %v1149_v5  ;;  %v391_v8 = vld [vmem:[%s1444_s1] sm:$0xf]  ;;  %s1152_s24 = smov 112   ;;  %s1153_s25 = smov 15   ;;  %v1372_v24 = vand.u32 127, %v445_v22  ;;  %vm688_vm15 = vcmask 64512  }
  0x3d   : > { %415 = vmatpush.bf16.msra.mxu0 %v396_v3  ;;  %s1154_s28 = smov 127   ;;  %s1155_s19 = smov 1   ;;  %v671_v21 = vld [vmem:[%s1449_s6] sm:$0xff]  ;;  %v578_v25 = vld [vmem:[#allocation7 + $0x10] ss:$8 sm:$0x3] }
  0x3e   : > { %428 = vmatpush.bf16.msra.mxu1 %v397_v7  ;;  %s1156_s14 = smov 16   ;;  %s1157_s18 = smov 17   ;;  %vm574_vm3 = vcmp.lt.s32.totalorder %v1372_v24, 111  ;;  %v580_v26 = vperm.slane %v578_v25, 0  ;;  %v581_v27 = vperm.slane %v578_v25, 1  ;;  %vm538_vm5 = vcmp.lt.s32.totalorder %v1372_v24, 113 }
  0x3f   : > { %v560_v34 = vld [vmem:[#allocation7 + $0x7] ss:$8 sm:$0x3]  ;;  %v542_v36 = vld [vmem:[#allocation7 + $0x6] ss:$8 sm:$0x3] }
  0x40   : > { %891 = vmatmul.msk.bf16.vlgmr.msra.gmra.mxu0 %vm404_vm0, %v391_v8  ;;  %v436_v11 = vstv %s387_s26  ;;  %vm556_vm6 = vcmp.lt.s32.totalorder %v1372_v24, 112  ;;  %v562_v39 = vperm.slane %v560_v34, 0  ;;  %v563_v40 = vperm.slane %v560_v34, 1  ;;  %v524_v55 = vld [vmem:[#allocation7 + $0x5] ss:$8 sm:$0x3] }
  0x41   : > { %892 = vmatmul.msk.bf16.vlgmr.msra.gmra.mxu1 %vm404_vm0, %v391_v8  ;;  %v544_v43 = vperm.slane %v542_v36, 0  ;;  %v545_v44 = vperm.slane %v542_v36, 1  ;;  %vm520_vm7 = vcmp.lt.s32.totalorder %v1372_v24, 127  ;;  %v526_v59 = vperm.slane %v524_v55, 0  ;;  %v617_v5 = vld [vmem:[%s1447_s4] sm:$0xff]  ;;  %s908_s22 = sshll.u32 %s1231_s13, 4 }
  0x42   : > { %v527_v60 = vperm.slane %v524_v55, 1  ;;  %v504_v8 = vld [vmem:[#allocation7 + $0x3] ss:$8 sm:$0x3]  ;;  %vm500_vm8 = vcmp.lt.s32.totalorder %v1372_v24, 1  ;;  %vm482_vm9 = vcmp.lt.s32.totalorder %v1372_v24, 15  ;;  %s776_s20 = scalar_lea.hbm %s1452_s9, %s908_s22 }
  0x43   : > { %vm447_vm10 = vcmp.lt.s32.totalorder %v1372_v24, 17  ;;  %vm464_vm11 = vcmp.lt.s32.totalorder %v1372_v24, 16  ;;  %v588_v24 = vld [vmem:[%s1446_s3] sm:$0xf]  ;;  %s383_s7 = scalar_lea.vmem [#allocation10], %s884_s8  ;;  %s779_s13 = sshll.u32 %s776_s20, 4  ;;  %s780_s13 = int_to_ptr.hbm [resolvable:$true] %s779_s13 }
  0x44   : > { %s777_s26 = sshll.u32 %s383_s7, 4  ;;  %s765_s8 = scalar_lea.sflag [#allocation5], %s1311_s23  ;;  %s1410_s26 = int_to_ptr.vmem [resolvable:$true] %s777_s26 }
  0xae   : > { %v402_v9 = vpop.permute.xlu0 %401 }
  0xbd   : > { %v417_v10 = vpop.f32.mrf.mxu0 }
  0xbe   : > { %v418_v12 = vadd.f32 %v417_v10, %v402_v9  ;;  %v430_v13 = vpop.f32.mrf.mxu1 }
  0xbf   : > { %v431_v14 = vadd.f32 %v430_v13, %v402_v9  ;;  %v486_v9 = vld [vmem:[#allocation7 + $0x2] ss:$8 sm:$0x3]  ;;  %v507_v13 = vperm.slane %v504_v8, 1 }
  0xc0   : > { %vm434_vm1 = vcmp.ge.f32.partialorder %v418_v12, 0.0  ;;  %v437_v15 = vmul.f32 %v436_v11, %v418_v12 }
  0xc1   : > { %vm435_vm2 = vcmp.ge.f32.partialorder %v431_v14, 0.0  ;;  %v438_v16 = vmul.f32 %v436_v11, %v431_v14 }
  0xc2   : > { %v1347_v17 = vsel %vm434_vm1, %v418_v12, %v437_v15  ;;  %v506_v12 = vperm.slane %v504_v8, 0  ;;  %v489_v15 = vperm.slane %v486_v9, 1 }
  0xc3   : > { %v1349_v18 = vsel %vm435_vm2, %v431_v14, %v438_v16  ;;  %570 = vrot.lane.b32.xlu0 %v1347_v17, %s1150_s27  ;;  %v488_v14 = vperm.slane %v486_v9, 0 }
  0xc4   : > { %536 = vrot.lane.b32.xlu2 %v1349_v18, %s1151_s17  ;;  %572 = vrot.lane.b32.xlu1 %v1349_v18, %s1150_s27  ;;  %s1082_s27 = sshra.s32 %s780_s13, 4  ;;  %s1083_s27 = int_to_ptr.hbm [resolvable:$true] %s1082_s27 }
  0xc5   : > { %v419_v19 = vpop.f32.mrf.mxu0  ;;  %p1089_p11 = scmp.lt.s32.totalorder %s1083_s27, %s1452_s9 }
  0xc6   : > { %v432_v20 = vpop.f32.mrf.mxu1 }
  0xcb   : > { %554 = vrot.lane.b32.xlu0 %v1349_v18, %s1152_s24 }
  0xcc   : > { %552 = vrot.lane.b32.xlu2 %v1347_v17, %s1152_s24  ;;  %534 = vrot.lane.b32.xlu1 %v1347_v17, %s1151_s17  ;;  %s888_s24 = sld [smem:[#allocation9 + $0x1]]  ;;  %s1084_s17 = scalar_lea.hbm %s1083_s27, 32 }
  0xcd   : > { %p1085_p1 = scmp.ne.s32.totalorder %s1083_s27, %s1084_s17 }
  0xcf   : > { %p1086_p4 = pnand %p1085_p1, %p1282_p5 }
  0xd1   : > { %p1087_p8 = pneg %p1086_p4 }
  0xd3   : > { %478 = vrot.lane.b32.xlu0 %v1347_v17, %s1153_s25 }
  0xd4   : > { %518 = vrot.lane.b32.xlu2 %v1349_v18, %s1154_s28  ;;  %516 = vrot.lane.b32.xlu1 %v1347_v17, %s1154_s28  ;;  %s1088_s28 = scalar_lea.hbm %s1452_s9, 64 }
  0xd5   : > { %p1090_p9 = scmp.lt.s32.totalorder %s1088_s28, %s1084_s17 }
  0xd7   : > { %p1091_p2 = por %p1090_p9, %p1089_p11 }
  0xd9   : > { %p1092_p10 = pnand %p1091_p2, %p1087_p8 }
  0xdb   : > { %498 = vrot.lane.b32.xlu0 %v1349_v18, %s1155_s19 }
  0xdc   : > { %496 = vrot.lane.b32.xlu2 %v1347_v17, %s1155_s19  ;;  %480 = vrot.lane.b32.xlu1 %v1349_v18, %s1153_s25  ;;  %s889_s19 = sld [smem:[#allocation9 + $0x2]] }
  0xe3   : > { %460 = vrot.lane.b32.xlu0 %v1347_v17, %s1156_s14 }
  0xe4   : > { %443 = vrot.lane.b32.xlu2 %v1349_v18, %s1157_s18  ;;  %441 = vrot.lane.b32.xlu1 %v1347_v17, %s1157_s18  ;;  %s890_s18 = sld [smem:[#allocation9 + $0x3]] }
  0xeb   : > { %675 = vperm.xlu0 %990, %v671_v21  }
  0xec   : > { %462 = vrot.lane.b32.xlu1 %v1349_v18, %s1156_s14  ;;  %620 = vperm.xlu2 %991, %v617_v5  }
 0x11e   : > { %v537_v23 = vpop.permute.xlu2 %536 }
 0x126   : > { %v553_v35 = vpop.permute.xlu2 %552 }
 0x12e   : > { %v519_v58 = vpop.permute.xlu2 %518 }
 0x135   : > { %v571_v28 = vpop.permute.xlu0 %570 }
 0x136   : > { %v573_v29 = vpop.permute.xlu1 %572  ;;  %v497_v16 = vpop.permute.xlu2 %496 }
 0x137   : > { %v575_v30 = vsel %vm574_vm3, %v571_v28, %v573_v29  ;;  %v576_v31 = vsel %vm574_vm3, %v573_v29, %v571_v28 }
 0x138   : > { %v584_v32 = vmul.f32 %v580_v26, %v575_v30  ;;  %v585_v33 = vmul.f32 %v581_v27, %v576_v31  ;;  %v450_v31 = vld [vmem:[#allocation7] ss:$8 sm:$0x3] }
 0x13a   : > { %v615_v37 = vpack.c.bf16 %v584_v32, %v584_v32  ;;  %v616_v38 = vpack.c.bf16 %v585_v33, %v585_v33  ;;  %v468_v32 = vld [vmem:[#allocation7 + $0x1] ss:$8 sm:$0x3]  ;;  %v452_v33 = vperm.slane %v450_v31, 0 }
 0x13b   : > { %v470_v36 = vperm.slane %v468_v32, 0 }
 0x13c   : > { %v629_v41 = vsel %vm627_vm4, %v615_v37, 0  ;;  %v632_v42 = vsel %vm627_vm4, %v616_v38, 0  ;;  %v471_v37 = vperm.slane %v468_v32, 1 }
 0x13d   : > { %637 = vmatpush.bf16.msra.mxu2 %v629_v41  ;;  %650 = vmatpush.bf16.msra.mxu3 %v632_v42  ;;  %v555_v45 = vpop.permute.xlu0 %554 }
 0x13e   : > { %v535_v46 = vpop.permute.xlu1 %534  ;;  %v557_v47 = vsel %vm556_vm6, %v553_v35, %v555_v45  ;;  %v558_v48 = vsel %vm556_vm6, %v555_v45, %v553_v35  ;;  %v444_v34 = vpop.permute.xlu2 %443  ;;  %v453_v35 = vperm.slane %v450_v31, 1 }
 0x13f   : > { %v539_v49 = vsel %vm538_vm5, %v535_v46, %v537_v23  ;;  %v540_v50 = vsel %vm538_vm5, %v537_v23, %v535_v46  ;;  %v566_v51 = vmul.f32 %v562_v39, %v557_v47  ;;  %v567_v52 = vmul.f32 %v563_v40, %v558_v48 }
 0x140   : > { %v548_v53 = vmul.f32 %v544_v43, %v539_v49  ;;  %v549_v54 = vmul.f32 %v545_v44, %v540_v50  ;;  %v672_v50 = vld [vmem:[%s1449_s6 + $0x8] sm:$0xff] }
 0x141   : > { %680 = vperm.xlu1 %992, %v672_v50  }
 0x142   : > { %v613_v56 = vpack.c.bf16 %v566_v51, %v548_v53  ;;  %v614_v57 = vpack.c.bf16 %v567_v52, %v549_v54  ;;  %v662_v53 = vstv %s888_s24 }
 0x144   : > { %638 = vmatpush.bf16.msra.mxu2 %v613_v56  ;;  %651 = vmatpush.bf16.msra.mxu3 %v614_v57 }
 0x145   : > { %v479_v61 = vpop.permute.xlu0 %478 }
 0x146   : > { %v517_v62 = vpop.permute.xlu1 %516  ;;  %v621_v51 = vpop.permute.xlu2 %620 }
 0x147   : > { %v521_v63 = vsel %vm520_vm7, %v517_v62, %v519_v58  ;;  %v522_v3 = vsel %vm520_vm7, %v519_v58, %v517_v62 }
 0x148   : > { %v530_v6 = vmul.f32 %v526_v59, %v521_v63  ;;  %v531_v7 = vmul.f32 %v527_v60, %v522_v3 }
 0x14a   : > { %v611_v10 = vpack.c.bf16 %v530_v6, %v1347_v17  ;;  %v612_v11 = vpack.c.bf16 %v531_v7, %v1349_v18  ;;  %v907_v7 = vld [vmem:[%s1448_s5] sm:$0xff] }
 0x14c   : > { %639 = vmatpush.bf16.msra.mxu2 %v611_v10  ;;  %652 = vmatpush.bf16.msra.mxu3 %v612_v11  ;;  %v730_v10 = vstv %s889_s19 }
 0x14d   : > { %v499_v19 = vpop.permute.xlu0 %498 }
 0x14e   : > { %v481_v20 = vpop.permute.xlu1 %480  ;;  %v501_v21 = vsel %vm500_vm8, %v497_v16, %v499_v19  ;;  %v502_v22 = vsel %vm500_vm8, %v499_v19, %v497_v16  ;;  %v751_v19 = vstv %s890_s18 }
 0x14f   : > { %v483_v23 = vsel %vm482_vm9, %v479_v61, %v481_v20  ;;  %v484_v25 = vsel %vm482_vm9, %v481_v20, %v479_v61  ;;  %v510_v17 = vmul.f32 %v506_v12, %v502_v22  ;;  %v511_v26 = vmul.f32 %v507_v13, %v501_v21 }
 0x150   : > { %v492_v18 = vmul.f32 %v488_v14, %v484_v25  ;;  %v493_v27 = vmul.f32 %v489_v15, %v483_v23 }
 0x152   : > { %v609_v28 = vpack.c.bf16 %v510_v17, %v492_v18  ;;  %v610_v29 = vpack.c.bf16 %v511_v26, %v493_v27 }
 0x154   : > { %640 = vmatpush.bf16.msra.mxu2 %v609_v28  ;;  %653 = vmatpush.bf16.msra.mxu3 %v610_v29 }
 0x155   : > { %v461_v40 = vpop.permute.xlu0 %460 }
 0x156   : > { %v442_v30 = vpop.permute.xlu1 %441 }
 0x157   : > { %v448_v38 = vsel %vm447_vm10, %v442_v30, %v444_v34  ;;  %v449_v39 = vsel %vm447_vm10, %v444_v34, %v442_v30 }
 0x158   : > { %v456_v44 = vmul.f32 %v452_v33, %v449_v39  ;;  %v457_v45 = vmul.f32 %v453_v35, %v448_v38 }
 0x15d   : > { %v676_v8 = vpop.permute.xlu0 %675 }
 0x15e   : > { %v463_v41 = vpop.permute.xlu1 %462 }
 0x15f   : > { %v465_v42 = vsel %vm464_vm11, %v461_v40, %v463_v41  ;;  %v466_v43 = vsel %vm464_vm11, %v463_v41, %v461_v40 }
 0x160   : > { %v474_v46 = vmul.f32 %v470_v36, %v466_v43  ;;  %v475_v47 = vmul.f32 %v471_v37, %v465_v42 }
 0x162   : > { %v607_v48 = vpack.c.bf16 %v474_v46, %v456_v44  ;;  %v608_v49 = vpack.c.bf16 %v475_v47, %v457_v45 }
 0x164   : > { %641 = vmatpush.bf16.msra.mxu2 %v607_v48  ;;  %654 = vmatpush.bf16.msra.mxu3 %v608_v49 }
 0x167   : > { %893 = vmatmul.msk.bf16.vlgmr.msra.gmra.mxu2 %vm623_vm12, %v588_v24  ;;  %894 = vmatmul.msk.bf16.vlgmr.msra.gmra.mxu3 %vm623_vm12, %v588_v24 }
 0x1b3   : > { %v681_v23 = vpop.permute.xlu1 %680 }
 0x1ea   : > { %v643_v52 = vpop.f32.mrf.mxu2  ;;  %v656_v54 = vpop.f32.mrf.mxu3 }
 0x1eb   : > { %v644_v55 = vadd.f32 %v643_v52, %v621_v51  ;;  %v657_v56 = vadd.f32 %v656_v54, %v621_v51 }
 0x1ed   : > { %v663_v57 = vmul.f32 %v662_v53, %v644_v55  ;;  %v664_v58 = vmul.f32 %v662_v53, %v657_v56  ;;  %vm660_vm13 = vcmp.ge.f32.partialorder %v644_v55, 0.0  ;;  %vm661_vm14 = vcmp.ge.f32.partialorder %v657_v56, 0.0 }
 0x1ef   : > { %v665_v59 = vsel %vm660_vm13, %v644_v55, %v663_v57  ;;  %v666_v60 = vsel %vm661_vm14, %v657_v56, %v664_v58 }
 0x1f0   : > { %v669_v61 = vpack.c.bf16 %v665_v59, %v665_v59  ;;  %v670_v62 = vpack.c.bf16 %v666_v60, %v666_v60 }
 0x1f2   : > { %v645_v63 = vpop.f32.mrf.mxu2  ;;  %v658_v3 = vpop.f32.mrf.mxu3  ;;  %v693_v5 = vsel %vm627_vm4, %v669_v61, 0  ;;  %v696_v6 = vsel %vm627_vm4, %v670_v62, 0 }
 0x1f3   : > { %705 = vmatpush.bf16.msrb.mxu0 %v693_v5  ;;  %719 = vmatpush.bf16.msrb.mxu1 %v696_v6 }
 0x1f6   : > { %899 = vmatmul.msk.bf16.vlgmr.msrb.gmra.mxu0 %vm688_vm15, %v907_v7  ;;  %900 = vmatmul.msk.bf16.vlgmr.msrb.gmra.mxu1 %vm688_vm15, %v907_v7 }
 0x273   : > { %v707_v9 = vpop.f32.mrf.mxu0  ;;  %v721_v11 = vpop.f32.mrf.mxu1 }
 0x274   : > { %v708_v12 = vadd.f32 %v707_v9, %v676_v8  ;;  %v722_v13 = vadd.f32 %v721_v11, %v676_v8 }
 0x276   : > { %vm726_vm0 = vcmp.ge.f32.partialorder %v708_v12, 0.0  ;;  %v731_v14 = vmul.f32 %v730_v10, %v708_v12  ;;  %vm727_vm1 = vcmp.ge.f32.partialorder %v722_v13, 0.0  ;;  %v732_v15 = vmul.f32 %v730_v10, %v722_v13 }
 0x278   : > { %v735_v16 = vsel %vm726_vm0, %v708_v12, %v731_v14  ;;  %v736_v20 = vsel %vm727_vm1, %v722_v13, %v732_v15 }
 0x279   : > { %v743_v21 = vadd.f32 %v735_v16, %v1329_v0  ;;  %v744_v22 = vadd.f32 %v736_v20, %v1333_v2 }
 0x27b   : > { %vm747_vm2 = vcmp.ge.f32.partialorder %v743_v21, 0.0  ;;  %v752_v25 = vmul.f32 %v751_v19, %v743_v21  ;;  %vm748_vm3 = vcmp.ge.f32.partialorder %v744_v22, 0.0  ;;  %v753_v17 = vmul.f32 %v751_v19, %v744_v22  ;;  %v709_v26 = vpop.f32.mrf.mxu0  ;;  %v723_v18 = vpop.f32.mrf.mxu1 }
 0x27c   : > { %v710_v27 = vadd.f32 %v709_v26, %v681_v23  ;;  %v724_v28 = vadd.f32 %v723_v18, %v681_v23 }
 0x27d   : > { %v756_v29 = vsel %vm747_vm2, %v743_v21, %v752_v25  ;;  %v757_v30 = vsel %vm748_vm3, %v744_v22, %v753_v17 }
 0x27e   : > { %760 = vst [vmem:[%s383_s7] sm:$0xff] %v756_v29  ;;  %vm728_vm4 = vcmp.ge.f32.partialorder %v710_v27, 0.0  ;;  %v733_v31 = vmul.f32 %v730_v10, %v710_v27  ;;  %vm729_vm5 = vcmp.ge.f32.partialorder %v724_v28, 0.0  ;;  %v734_v0 = vmul.f32 %v730_v10, %v724_v28 }
 0x27f   : > { %761 = vst [vmem:[%s383_s7 + $0x8] sm:$0xff] %v757_v30 }
 0x280   : > { %v737_v2 = vsel %vm728_vm4, %v710_v27, %v733_v31  ;;  %v738_v32 = vsel %vm729_vm5, %v724_v28, %v734_v0 }
 0x281   : > { %v745_v33 = vadd.f32 %v737_v2, %v1331_v1  ;;  %v746_v34 = vadd.f32 %v738_v32, %v1337_v4 }
 0x283   : > { %vm749_vm6 = vcmp.ge.f32.partialorder %v745_v33, 0.0  ;;  %v754_v35 = vmul.f32 %v751_v19, %v745_v33  ;;  %vm750_vm7 = vcmp.ge.f32.partialorder %v746_v34, 0.0  ;;  %v755_v36 = vmul.f32 %v751_v19, %v746_v34 }
 0x285   : > { %v758_v37 = vsel %vm749_vm6, %v745_v33, %v754_v35  ;;  %v759_v38 = vsel %vm750_vm7, %v746_v34, %v755_v36 }
 0x286   : > { %762 = vst [vmem:[%s383_s7 + $0x10] sm:$0xff] %v758_v37 }
 0x287   : > { %763 = vst [vmem:[%s383_s7 + $0x18] sm:$0xff] %v759_v38 }
 0x288   : > { %1095 = shalt.err (!%p1092_p10)
}
 0x289   : > { %s1158_s23 = smov 256   ;;  %s1159_s22 = smov 512  }
 0x28a   : > { %919 = dma.vmem_to_hbm [thread:$0]  (%p1282_p5), %s1410_s26, 512, %s780_s13, %s765_s8, %s1158_s23, %s1159_s22, %s1156_s14  }
 0x28b PF: > { %s794_s7 = sand.u32 1, %s1130_s30   ;;  %p1469_p12 = scmp.ge.s32.totalorder %s1142_s12, 2 }
 0x28c   : > { %s795_s11 = scalar_lea.sflag [#allocation5], %s794_s7 }
 0x28d   : > { %p933_p13 = pnand %p1469_p12, %p1245_p6 }
 0x28f   : > { %p934_p0 = pneg %p933_p13 }
 0x291   : > { %1125 = dma.done.wait (%p934_p0), %s795_s11, 512  }
 0x292   : > { %1127 = vsyncadd (%p934_p0), %s795_s11, 4294966784  ;;  %s1470_s15 = sld [smem:[#allocation15_spill]]  ;;  %p24_p3 = scmp.ge.s32.totalorder %s1269_s29, 4  }
 0x293   : > { %s1471_s11 = sld [smem:[#allocation16_spill]]  ;;  %s1472_s30 = smov %s1134_s10 }
 0x294   : > { %s1474_s12 = smov %s1269_s29  ;;  %26 = sbr.rel (!%p24_p3) target bundleno = 10 (0xa), region = 117 }
 0x298   : > { %s1473_s10 = smov %s1470_s15 }
 0x299   :  { %801 = vsyncpa [#allocation4], 1 }
 0x29a   :  { %803 = vsyncpa [#allocation4 + $0x1], 1 }
 0x29b   :  { %804 = vsyncpa [#allocation8], 1 }
 0x29c   :  { %805 = vsyncpa [#allocation5], 1 }
 0x29d   :  { %807 = vsyncpa [#allocation5 + $0x1], 1 }
 0x29e   :  { %808 = vsyncpa [#allocation6], 1 }
 0x29f   :  { %810 = vsyncpa [#allocation6 + $0x1], 1 }

</bundles_post_ra>
